<compile_context>
chip_gen: v6e
topology: v6e:2x2x1
jax: 0.10.0
libtpu: 0.0.40
codegen_flags: <defaults>
</compile_context>

<pallas_src>
import jax
import jax.numpy as jnp
from jax.experimental import pallas as pl
from jax.experimental.pallas import tpu as pltpu


def _pgn_kernel(x_ref, w1_ref, b1_ref, w3_ref, b3_ref, o_ref):
    x = x_ref[...]                      # [8, TB]   batch on lanes
    w1 = w1_ref[...]                    # [16, 8]   PyTorch (out, in) layout
    w3 = w3_ref[...]                    # [4, 16]

    # fc1 as 8 broadcast-FMA outer products on the VPU. Bias seeds the accumulator.
    h = b1_ref[...] + w1[:, 0:1] * x[0:1, :]          # [16, TB]
    for k in range(1, 8):                             # unrolled at trace time
        h = h + w1[:, k:k + 1] * x[k:k + 1, :]

    # Reference applies tanh twice (fc2 is never called in forward()). Keep the
    # transcendentals on the EUP -- it has 2-3x slack while the VALU binds.
    h = jnp.tanh(jnp.tanh(h))

    # fc3, same VPU outer-product form.
    logits = b3_ref[...] + w3[:, 0:1] * h[0:1, :]     # [4, TB]
    for k in range(1, 16):
        logits = logits + w3[:, k:k + 1] * h[k:k + 1, :]

    # Softmax over the 4 action logits (feature axis = sublanes in this layout).
    # Exact divide so each column sums to 1 within fp32 rounding (the approx
    # reciprocal previously broke the sum-to-1 check).
    m = jnp.max(logits, axis=0, keepdims=True)        # [1, TB]
    e = jnp.exp(logits - m)
    s = jnp.sum(e, axis=0, keepdims=True)             # [1, TB]
    o_ref[...] = e / s                                # lane-dense [4, TB] store


def _round_up(n, m):
    return ((n + m - 1) // m) * m


def _choose_tile(batch, max_tile):
    """Batch-tile (lane) size: big enough to amortize per-step overhead, capped
    for VMEM, and (when possible) at most half the batch so the grid has >= 2
    steps for the two-TensorCore split on v7x."""
    lanes = _round_up(batch, 128)
    if lanes <= 128:
        return 128
    return min(max_tile, _round_up(pl.cdiv(lanes, 2), 128))


def policy_gradient_forward_t(xt, w1, b1, w3, b3, *, max_tile_b=65536):
    """Transposed-layout entry point (no wrapper transposes).

    xt: [8, B] f32 (batch on lanes). Weights in PyTorch layout:
    w1 [16,8], b1 [16], w3 [4,16], b3 [4]. Returns probabilities [4, B].
    """
    _, B = xt.shape
    tile = _choose_tile(B, max_tile_b)
    grid = (pl.cdiv(B, tile),)          # ragged last block: output write is bounded

    b1c = b1.reshape(16, 1).astype(jnp.float32)
    b3c = b3.reshape(4, 1).astype(jnp.float32)

    return pl.pallas_call(
        _pgn_kernel,
        out_shape=jax.ShapeDtypeStruct((4, B), jnp.float32),
        grid_spec=pltpu.PrefetchScalarGridSpec(
            num_scalar_prefetch=0,
            grid=grid,
            in_specs=[
                pl.BlockSpec((8, tile), lambda i: (0, i)),   # x^T tile (lane-dense)
                pl.BlockSpec((16, 8), lambda i: (0, 0)),     # w1, VMEM-resident
                pl.BlockSpec((16, 1), lambda i: (0, 0)),     # b1
                pl.BlockSpec((4, 16), lambda i: (0, 0)),     # w3
                pl.BlockSpec((4, 1), lambda i: (0, 0)),      # b3
            ],
            out_specs=pl.BlockSpec((4, tile), lambda i: (0, i)),
        ),
        compiler_params=pltpu.CompilerParams(
            dimension_semantics=("parallel",),               # shards over v7x's 2 TCs
            vmem_limit_bytes=32 * 1024 * 1024,               # safe on v5e/v6e/v7x
        ),
    )(xt.astype(jnp.float32), w1.astype(jnp.float32), b1c,
      w3.astype(jnp.float32), b3c)


def policy_gradient_forward(x, w1, b1, w3, b3, *, max_tile_b=65536):
    """x: [B, 8] f32. Returns softmax action probabilities [B, 4] (module semantics)."""
    out_t = policy_gradient_forward_t(x.T, w1, b1, w3, b3, max_tile_b=max_tile_b)
    return out_t.T


def init_params(key):
    """Deterministic synthetic parameters in native PyTorch Linear layout (out, in)."""
    k1, k2, k3, k4, k5, k6 = jax.random.split(key, 6)
    w1 = jax.random.normal(k1, (16, 8), jnp.float32) * 0.1
    b1 = jax.random.normal(k2, (16,), jnp.float32) * 0.1
    # fc2 params exist in the module but are not used by forward (parity only).
    w2 = jax.random.normal(k3, (16, 16), jnp.float32) * 0.1
    b2 = jax.random.normal(k4, (16,), jnp.float32) * 0.1
    w3 = jax.random.normal(k5, (4, 16), jnp.float32) * 0.1
    b3 = jax.random.normal(k6, (4,), jnp.float32) * 0.1
    return w1, b1, w2, b2, w3, b3


if __name__ == "__main__":
    key = jax.random.PRNGKey(0)
    kx, kp = jax.random.split(key)
    w1, b1, _w2, _b2, w3, b3 = init_params(kp)

    def ref_forward(xb):
        h = jnp.tanh(xb @ w1.T + b1)
        h = jnp.tanh(h)
        return jax.nn.softmax(h @ w3.T + b3, axis=-1)

    # B=8: tiny batch (single 128-lane tile). B=300: two grid steps (megacore
    # split) plus a ragged last block, with no wrapper-side padding pass.
    for B in (8, 300):
        xb = jax.random.normal(jax.random.fold_in(kx, B), (B, 8), jnp.float32)
        out = jax.block_until_ready(policy_gradient_forward(xb, w1, b1, w3, b3))
        ref = ref_forward(xb)
        assert out.shape == (B, 4)
        assert jnp.allclose(out, ref, atol=1e-4, rtol=1e-4), float(
            jnp.max(jnp.abs(out - ref)))
        assert jnp.allclose(jnp.sum(out, axis=-1), 1.0, atol=1e-4)

    print("KERNEL_OK")
</pallas_src>

<mosaic_0001>
module attributes {stable_mosaic.version = 11 : i64} {
  func.func @_pgn_kernel(%arg0: i32, %arg1: memref<8x128xf32, #tpu.memory_space<vmem>>, %arg2: memref<16x8xf32, #tpu.memory_space<vmem>>, %arg3: memref<16x1xf32, #tpu.memory_space<vmem>>, %arg4: memref<4x16xf32, #tpu.memory_space<vmem>>, %arg5: memref<4x1xf32, #tpu.memory_space<vmem>>, %arg6: memref<4x128xf32, #tpu.memory_space<vmem>>) attributes {dimension_semantics = [#tpu.dimension_semantics<parallel>], iteration_bounds = array<i64: 1>, scalar_prefetch = 0 : i64, scratch_operands = 0 : i64, tpu.core_type = #tpu.core_type<tc>, window_params = [{transform_indices = @transform_0, window_bounds = array<i64: 8, 128>}, {pipeline_mode = #tpu.pipeline_mode<synchronous>, transform_indices = @transform_1, window_bounds = array<i64: 16, 8>}, {pipeline_mode = #tpu.pipeline_mode<synchronous>, transform_indices = @transform_2, window_bounds = array<i64: 16, 1>}, {pipeline_mode = #tpu.pipeline_mode<synchronous>, transform_indices = @transform_3, window_bounds = array<i64: 4, 16>}, {pipeline_mode = #tpu.pipeline_mode<synchronous>, transform_indices = @transform_4, window_bounds = array<i64: 4, 1>}, {transform_indices = @transform_5, window_bounds = array<i64: 4, 128>}]} {
    %c0 = arith.constant 0 : index
    %c0_0 = arith.constant 0 : index
    %0 = vector.load %arg1[%c0, %c0_0] : memref<8x128xf32, #tpu.memory_space<vmem>>, vector<8x128xf32>
    %c0_1 = arith.constant 0 : index
    %c0_2 = arith.constant 0 : index
    %1 = vector.load %arg2[%c0_1, %c0_2] : memref<16x8xf32, #tpu.memory_space<vmem>>, vector<16x8xf32>
    %c0_3 = arith.constant 0 : index
    %c0_4 = arith.constant 0 : index
    %2 = vector.load %arg4[%c0_3, %c0_4] : memref<4x16xf32, #tpu.memory_space<vmem>>, vector<4x16xf32>
    %c0_5 = arith.constant 0 : index
    %c0_6 = arith.constant 0 : index
    %3 = vector.load %arg3[%c0_5, %c0_6] : memref<16x1xf32, #tpu.memory_space<vmem>>, vector<16x1xf32>
    %4 = vector.extract_strided_slice %1 {offsets = [0, 0], sizes = [16, 1], strides = [1, 1]} : vector<16x8xf32> to vector<16x1xf32>
    %5 = vector.extract_strided_slice %0 {offsets = [0, 0], sizes = [1, 128], strides = [1, 1]} : vector<8x128xf32> to vector<1x128xf32>
    %6 = vector.broadcast %4 : vector<16x1xf32> to vector<16x128xf32>
    %7 = vector.broadcast %5 : vector<1x128xf32> to vector<16x128xf32>
    %8 = arith.mulf %6, %7 : vector<16x128xf32>
    %9 = vector.broadcast %3 : vector<16x1xf32> to vector<16x128xf32>
    %10 = arith.addf %9, %8 : vector<16x128xf32>
    %11 = vector.extract_strided_slice %1 {offsets = [0, 1], sizes = [16, 1], strides = [1, 1]} : vector<16x8xf32> to vector<16x1xf32>
    %12 = vector.extract_strided_slice %0 {offsets = [1, 0], sizes = [1, 128], strides = [1, 1]} : vector<8x128xf32> to vector<1x128xf32>
    %13 = vector.broadcast %11 : vector<16x1xf32> to vector<16x128xf32>
    %14 = vector.broadcast %12 : vector<1x128xf32> to vector<16x128xf32>
    %15 = arith.mulf %13, %14 : vector<16x128xf32>
    %16 = arith.addf %10, %15 : vector<16x128xf32>
    %17 = vector.extract_strided_slice %1 {offsets = [0, 2], sizes = [16, 1], strides = [1, 1]} : vector<16x8xf32> to vector<16x1xf32>
    %18 = vector.extract_strided_slice %0 {offsets = [2, 0], sizes = [1, 128], strides = [1, 1]} : vector<8x128xf32> to vector<1x128xf32>
    %19 = vector.broadcast %17 : vector<16x1xf32> to vector<16x128xf32>
    %20 = vector.broadcast %18 : vector<1x128xf32> to vector<16x128xf32>
    %21 = arith.mulf %19, %20 : vector<16x128xf32>
    %22 = arith.addf %16, %21 : vector<16x128xf32>
    %23 = vector.extract_strided_slice %1 {offsets = [0, 3], sizes = [16, 1], strides = [1, 1]} : vector<16x8xf32> to vector<16x1xf32>
    %24 = vector.extract_strided_slice %0 {offsets = [3, 0], sizes = [1, 128], strides = [1, 1]} : vector<8x128xf32> to vector<1x128xf32>
    %25 = vector.broadcast %23 : vector<16x1xf32> to vector<16x128xf32>
    %26 = vector.broadcast %24 : vector<1x128xf32> to vector<16x128xf32>
    %27 = arith.mulf %25, %26 : vector<16x128xf32>
    %28 = arith.addf %22, %27 : vector<16x128xf32>
    %29 = vector.extract_strided_slice %1 {offsets = [0, 4], sizes = [16, 1], strides = [1, 1]} : vector<16x8xf32> to vector<16x1xf32>
    %30 = vector.extract_strided_slice %0 {offsets = [4, 0], sizes = [1, 128], strides = [1, 1]} : vector<8x128xf32> to vector<1x128xf32>
    %31 = vector.broadcast %29 : vector<16x1xf32> to vector<16x128xf32>
    %32 = vector.broadcast %30 : vector<1x128xf32> to vector<16x128xf32>
    %33 = arith.mulf %31, %32 : vector<16x128xf32>
    %34 = arith.addf %28, %33 : vector<16x128xf32>
    %35 = vector.extract_strided_slice %1 {offsets = [0, 5], sizes = [16, 1], strides = [1, 1]} : vector<16x8xf32> to vector<16x1xf32>
    %36 = vector.extract_strided_slice %0 {offsets = [5, 0], sizes = [1, 128], strides = [1, 1]} : vector<8x128xf32> to vector<1x128xf32>
    %37 = vector.broadcast %35 : vector<16x1xf32> to vector<16x128xf32>
    %38 = vector.broadcast %36 : vector<1x128xf32> to vector<16x128xf32>
    %39 = arith.mulf %37, %38 : vector<16x128xf32>
    %40 = arith.addf %34, %39 : vector<16x128xf32>
    %41 = vector.extract_strided_slice %1 {offsets = [0, 6], sizes = [16, 1], strides = [1, 1]} : vector<16x8xf32> to vector<16x1xf32>
    %42 = vector.extract_strided_slice %0 {offsets = [6, 0], sizes = [1, 128], strides = [1, 1]} : vector<8x128xf32> to vector<1x128xf32>
    %43 = vector.broadcast %41 : vector<16x1xf32> to vector<16x128xf32>
    %44 = vector.broadcast %42 : vector<1x128xf32> to vector<16x128xf32>
    %45 = arith.mulf %43, %44 : vector<16x128xf32>
    %46 = arith.addf %40, %45 : vector<16x128xf32>
    %47 = vector.extract_strided_slice %1 {offsets = [0, 7], sizes = [16, 1], strides = [1, 1]} : vector<16x8xf32> to vector<16x1xf32>
    %48 = vector.extract_strided_slice %0 {offsets = [7, 0], sizes = [1, 128], strides = [1, 1]} : vector<8x128xf32> to vector<1x128xf32>
    %49 = vector.broadcast %47 : vector<16x1xf32> to vector<16x128xf32>
    %50 = vector.broadcast %48 : vector<1x128xf32> to vector<16x128xf32>
    %51 = arith.mulf %49, %50 : vector<16x128xf32>
    %52 = arith.addf %46, %51 : vector<16x128xf32>
    %53 = math.tanh %52 : vector<16x128xf32>
    %54 = math.tanh %53 : vector<16x128xf32>
    %c0_7 = arith.constant 0 : index
    %c0_8 = arith.constant 0 : index
    %55 = vector.load %arg5[%c0_7, %c0_8] : memref<4x1xf32, #tpu.memory_space<vmem>>, vector<4x1xf32>
    %56 = vector.extract_strided_slice %2 {offsets = [0, 0], sizes = [4, 1], strides = [1, 1]} : vector<4x16xf32> to vector<4x1xf32>
    %57 = vector.extract_strided_slice %54 {offsets = [0, 0], sizes = [1, 128], strides = [1, 1]} : vector<16x128xf32> to vector<1x128xf32>
    %58 = vector.broadcast %56 : vector<4x1xf32> to vector<4x128xf32>
    %59 = vector.broadcast %57 : vector<1x128xf32> to vector<4x128xf32>
    %60 = arith.mulf %58, %59 : vector<4x128xf32>
    %61 = vector.broadcast %55 : vector<4x1xf32> to vector<4x128xf32>
    %62 = arith.addf %61, %60 : vector<4x128xf32>
    %63 = vector.extract_strided_slice %2 {offsets = [0, 1], sizes = [4, 1], strides = [1, 1]} : vector<4x16xf32> to vector<4x1xf32>
    %64 = vector.extract_strided_slice %54 {offsets = [1, 0], sizes = [1, 128], strides = [1, 1]} : vector<16x128xf32> to vector<1x128xf32>
    %65 = vector.broadcast %63 : vector<4x1xf32> to vector<4x128xf32>
    %66 = vector.broadcast %64 : vector<1x128xf32> to vector<4x128xf32>
    %67 = arith.mulf %65, %66 : vector<4x128xf32>
    %68 = arith.addf %62, %67 : vector<4x128xf32>
    %69 = vector.extract_strided_slice %2 {offsets = [0, 2], sizes = [4, 1], strides = [1, 1]} : vector<4x16xf32> to vector<4x1xf32>
    %70 = vector.extract_strided_slice %54 {offsets = [2, 0], sizes = [1, 128], strides = [1, 1]} : vector<16x128xf32> to vector<1x128xf32>
    %71 = vector.broadcast %69 : vector<4x1xf32> to vector<4x128xf32>
    %72 = vector.broadcast %70 : vector<1x128xf32> to vector<4x128xf32>
    %73 = arith.mulf %71, %72 : vector<4x128xf32>
    %74 = arith.addf %68, %73 : vector<4x128xf32>
    %75 = vector.extract_strided_slice %2 {offsets = [0, 3], sizes = [4, 1], strides = [1, 1]} : vector<4x16xf32> to vector<4x1xf32>
    %76 = vector.extract_strided_slice %54 {offsets = [3, 0], sizes = [1, 128], strides = [1, 1]} : vector<16x128xf32> to vector<1x128xf32>
    %77 = vector.broadcast %75 : vector<4x1xf32> to vector<4x128xf32>
    %78 = vector.broadcast %76 : vector<1x128xf32> to vector<4x128xf32>
    %79 = arith.mulf %77, %78 : vector<4x128xf32>
    %80 = arith.addf %74, %79 : vector<4x128xf32>
    %81 = vector.extract_strided_slice %2 {offsets = [0, 4], sizes = [4, 1], strides = [1, 1]} : vector<4x16xf32> to vector<4x1xf32>
    %82 = vector.extract_strided_slice %54 {offsets = [4, 0], sizes = [1, 128], strides = [1, 1]} : vector<16x128xf32> to vector<1x128xf32>
    %83 = vector.broadcast %81 : vector<4x1xf32> to vector<4x128xf32>
    %84 = vector.broadcast %82 : vector<1x128xf32> to vector<4x128xf32>
    %85 = arith.mulf %83, %84 : vector<4x128xf32>
    %86 = arith.addf %80, %85 : vector<4x128xf32>
    %87 = vector.extract_strided_slice %2 {offsets = [0, 5], sizes = [4, 1], strides = [1, 1]} : vector<4x16xf32> to vector<4x1xf32>
    %88 = vector.extract_strided_slice %54 {offsets = [5, 0], sizes = [1, 128], strides = [1, 1]} : vector<16x128xf32> to vector<1x128xf32>
    %89 = vector.broadcast %87 : vector<4x1xf32> to vector<4x128xf32>
    %90 = vector.broadcast %88 : vector<1x128xf32> to vector<4x128xf32>
    %91 = arith.mulf %89, %90 : vector<4x128xf32>
    %92 = arith.addf %86, %91 : vector<4x128xf32>
    %93 = vector.extract_strided_slice %2 {offsets = [0, 6], sizes = [4, 1], strides = [1, 1]} : vector<4x16xf32> to vector<4x1xf32>
    %94 = vector.extract_strided_slice %54 {offsets = [6, 0], sizes = [1, 128], strides = [1, 1]} : vector<16x128xf32> to vector<1x128xf32>
    %95 = vector.broadcast %93 : vector<4x1xf32> to vector<4x128xf32>
    %96 = vector.broadcast %94 : vector<1x128xf32> to vector<4x128xf32>
    %97 = arith.mulf %95, %96 : vector<4x128xf32>
    %98 = arith.addf %92, %97 : vector<4x128xf32>
    %99 = vector.extract_strided_slice %2 {offsets = [0, 7], sizes = [4, 1], strides = [1, 1]} : vector<4x16xf32> to vector<4x1xf32>
    %100 = vector.extract_strided_slice %54 {offsets = [7, 0], sizes = [1, 128], strides = [1, 1]} : vector<16x128xf32> to vector<1x128xf32>
    %101 = vector.broadcast %99 : vector<4x1xf32> to vector<4x128xf32>
    %102 = vector.broadcast %100 : vector<1x128xf32> to vector<4x128xf32>
    %103 = arith.mulf %101, %102 : vector<4x128xf32>
    %104 = arith.addf %98, %103 : vector<4x128xf32>
    %105 = vector.extract_strided_slice %2 {offsets = [0, 8], sizes = [4, 1], strides = [1, 1]} : vector<4x16xf32> to vector<4x1xf32>
    %106 = vector.extract_strided_slice %54 {offsets = [8, 0], sizes = [1, 128], strides = [1, 1]} : vector<16x128xf32> to vector<1x128xf32>
    %107 = vector.broadcast %105 : vector<4x1xf32> to vector<4x128xf32>
    %108 = vector.broadcast %106 : vector<1x128xf32> to vector<4x128xf32>
    %109 = arith.mulf %107, %108 : vector<4x128xf32>
    %110 = arith.addf %104, %109 : vector<4x128xf32>
    %111 = vector.extract_strided_slice %2 {offsets = [0, 9], sizes = [4, 1], strides = [1, 1]} : vector<4x16xf32> to vector<4x1xf32>
    %112 = vector.extract_strided_slice %54 {offsets = [9, 0], sizes = [1, 128], strides = [1, 1]} : vector<16x128xf32> to vector<1x128xf32>
    %113 = vector.broadcast %111 : vector<4x1xf32> to vector<4x128xf32>
    %114 = vector.broadcast %112 : vector<1x128xf32> to vector<4x128xf32>
    %115 = arith.mulf %113, %114 : vector<4x128xf32>
    %116 = arith.addf %110, %115 : vector<4x128xf32>
    %117 = vector.extract_strided_slice %2 {offsets = [0, 10], sizes = [4, 1], strides = [1, 1]} : vector<4x16xf32> to vector<4x1xf32>
    %118 = vector.extract_strided_slice %54 {offsets = [10, 0], sizes = [1, 128], strides = [1, 1]} : vector<16x128xf32> to vector<1x128xf32>
    %119 = vector.broadcast %117 : vector<4x1xf32> to vector<4x128xf32>
    %120 = vector.broadcast %118 : vector<1x128xf32> to vector<4x128xf32>
    %121 = arith.mulf %119, %120 : vector<4x128xf32>
    %122 = arith.addf %116, %121 : vector<4x128xf32>
    %123 = vector.extract_strided_slice %2 {offsets = [0, 11], sizes = [4, 1], strides = [1, 1]} : vector<4x16xf32> to vector<4x1xf32>
    %124 = vector.extract_strided_slice %54 {offsets = [11, 0], sizes = [1, 128], strides = [1, 1]} : vector<16x128xf32> to vector<1x128xf32>
    %125 = vector.broadcast %123 : vector<4x1xf32> to vector<4x128xf32>
    %126 = vector.broadcast %124 : vector<1x128xf32> to vector<4x128xf32>
    %127 = arith.mulf %125, %126 : vector<4x128xf32>
    %128 = arith.addf %122, %127 : vector<4x128xf32>
    %129 = vector.extract_strided_slice %2 {offsets = [0, 12], sizes = [4, 1], strides = [1, 1]} : vector<4x16xf32> to vector<4x1xf32>
    %130 = vector.extract_strided_slice %54 {offsets = [12, 0], sizes = [1, 128], strides = [1, 1]} : vector<16x128xf32> to vector<1x128xf32>
    %131 = vector.broadcast %129 : vector<4x1xf32> to vector<4x128xf32>
    %132 = vector.broadcast %130 : vector<1x128xf32> to vector<4x128xf32>
    %133 = arith.mulf %131, %132 : vector<4x128xf32>
    %134 = arith.addf %128, %133 : vector<4x128xf32>
    %135 = vector.extract_strided_slice %2 {offsets = [0, 13], sizes = [4, 1], strides = [1, 1]} : vector<4x16xf32> to vector<4x1xf32>
    %136 = vector.extract_strided_slice %54 {offsets = [13, 0], sizes = [1, 128], strides = [1, 1]} : vector<16x128xf32> to vector<1x128xf32>
    %137 = vector.broadcast %135 : vector<4x1xf32> to vector<4x128xf32>
    %138 = vector.broadcast %136 : vector<1x128xf32> to vector<4x128xf32>
    %139 = arith.mulf %137, %138 : vector<4x128xf32>
    %140 = arith.addf %134, %139 : vector<4x128xf32>
    %141 = vector.extract_strided_slice %2 {offsets = [0, 14], sizes = [4, 1], strides = [1, 1]} : vector<4x16xf32> to vector<4x1xf32>
    %142 = vector.extract_strided_slice %54 {offsets = [14, 0], sizes = [1, 128], strides = [1, 1]} : vector<16x128xf32> to vector<1x128xf32>
    %143 = vector.broadcast %141 : vector<4x1xf32> to vector<4x128xf32>
    %144 = vector.broadcast %142 : vector<1x128xf32> to vector<4x128xf32>
    %145 = arith.mulf %143, %144 : vector<4x128xf32>
    %146 = arith.addf %140, %145 : vector<4x128xf32>
    %147 = vector.extract_strided_slice %2 {offsets = [0, 15], sizes = [4, 1], strides = [1, 1]} : vector<4x16xf32> to vector<4x1xf32>
    %148 = vector.extract_strided_slice %54 {offsets = [15, 0], sizes = [1, 128], strides = [1, 1]} : vector<16x128xf32> to vector<1x128xf32>
    %149 = vector.broadcast %147 : vector<4x1xf32> to vector<4x128xf32>
    %150 = vector.broadcast %148 : vector<1x128xf32> to vector<4x128xf32>
    %151 = arith.mulf %149, %150 : vector<4x128xf32>
    %152 = arith.addf %146, %151 : vector<4x128xf32>
    %cst = arith.constant dense<0xFF800000> : vector<128xf32>
    %153 = vector.multi_reduction <maximumf>, %152, %cst [0] : vector<4x128xf32> to vector<128xf32>
    %154 = vector.shape_cast %153 : vector<128xf32> to vector<1x128xf32>
    %155 = vector.broadcast %154 : vector<1x128xf32> to vector<4x128xf32>
    %156 = arith.subf %152, %155 : vector<4x128xf32>
    %157 = math.exp %156 : vector<4x128xf32>
    %cst_9 = arith.constant dense<0.000000e+00> : vector<128xf32>
    %158 = vector.multi_reduction <add>, %157, %cst_9 [0] : vector<4x128xf32> to vector<128xf32>
    %159 = vector.shape_cast %158 : vector<128xf32> to vector<1x128xf32>
    %160 = vector.broadcast %159 : vector<1x128xf32> to vector<4x128xf32>
    %161 = arith.divf %157, %160 : vector<4x128xf32>
    %c0_10 = arith.constant 0 : index
    %c0_11 = arith.constant 0 : index
    %162 = vector.load %arg6[%c0_10, %c0_11] : memref<4x128xf32, #tpu.memory_space<vmem>>, vector<4x128xf32>
    tpu.vector_store %arg6[%c0_10, %c0_11], %161 {strides = array<i32>} : memref<4x128xf32, #tpu.memory_space<vmem>>, vector<4x128xf32>,
    return
  }
  func.func @transform_0(%arg0: i32) -> (i32, i32) {
    %c0_i32 = arith.constant 0 : i32
    %c0_i32_0 = arith.constant 0 : i32
    return %c0_i32, %arg0 : i32, i32
  }
  func.func @transform_1(%arg0: i32) -> (i32, i32) {
    %c0_i32 = arith.constant 0 : i32
    %c0_i32_0 = arith.constant 0 : i32
    %c0_i32_1 = arith.constant 0 : i32
    return %c0_i32, %c0_i32_0 : i32, i32
  }
  func.func @transform_2(%arg0: i32) -> (i32, i32) {
    %c0_i32 = arith.constant 0 : i32
    %c0_i32_0 = arith.constant 0 : i32
    %c0_i32_1 = arith.constant 0 : i32
    return %c0_i32, %c0_i32_0 : i32, i32
  }
  func.func @transform_3(%arg0: i32) -> (i32, i32) {
    %c0_i32 = arith.constant 0 : i32
    %c0_i32_0 = arith.constant 0 : i32
    %c0_i32_1 = arith.constant 0 : i32
    return %c0_i32, %c0_i32_0 : i32, i32
  }
  func.func @transform_4(%arg0: i32) -> (i32, i32) {
    %c0_i32 = arith.constant 0 : i32
    %c0_i32_0 = arith.constant 0 : i32
    %c0_i32_1 = arith.constant 0 : i32
    return %c0_i32, %c0_i32_0 : i32, i32
  }
  func.func @transform_5(%arg0: i32) -> (i32, i32) {
    %c0_i32 = arith.constant 0 : i32
    %c0_i32_0 = arith.constant 0 : i32
    return %c0_i32, %arg0 : i32, i32
  }
}

</mosaic_0001>

<bundles_post_ra>
// kernel: tpu_custom_call.1
= control target key start
LH: loop header
LB: loop body
LE: loop exit
PB: predicated region body
PF: predicated region fallthrough
CT: control target
= control target key end

     0   :  { %v458_v1 = vmov 1   ;;  %v459_v2 = vmov 0   ;;  %s572_s0 = inlined_call_operand.vmem [shape: f32[8,8], index: 0, kind: input, shape index: {}]   ;;  %s573_s1 = inlined_call_operand.vmem [shape: f32[16,8], index: 1, kind: input, shape index: {}]   ;;  %s574_s2 = inlined_call_operand.vmem [shape: f32[16,1], index: 2, kind: input, shape index: {}]   ;;  %s575_s3 = inlined_call_operand.vmem [shape: f32[4,16], index: 3, kind: input, shape index: {}]   ;;  %s576_s4 = inlined_call_operand.vmem [shape: f32[4,1], index: 4, kind: input, shape index: {}]   ;;  %s577_s5 = inlined_call_operand.hbm [shape: f32[4,8], index: 5, kind: output, shape index: {}]  }
   0x1   :  { %v22_v0 = vld [vmem:[%s573_s1] sm:$0xff]  ;;  %391 = vset.pattern.permute.xlu1 %v458_v1  ;;  %390 = vset.pattern.permute.xlu0 %v459_v2 }
   0x2   :  { %56 = vperm.xlu1 %391, %v22_v0   ;;  %29 = vperm.xlu0 %390, %v22_v0   ;;  %v25_v3 = vld [vmem:[%s574_s2] sm:$0xff] }
   0x3   :  { %10 = vsyncpa [#allocation3], 0  ;;  %v460_v4 = vmov 2   ;;  %v461_v5 = vmov 3   ;;  %v462_v6 = vmov 4   ;;  %v463_v7 = vmov 6  }
   0x4   :  { %v464_v8 = vmov 5   ;;  %v26_v9 = vld [vmem:[%s574_s2 + $0x8] sm:$0xff]  ;;  %v465_v10 = vmov 7   ;;  %v171_v12 = vld [vmem:[%s576_s4] sm:$0xf]  ;;  %v466_v14 = vmov 9   ;;  %v37_v22 = vlaneseq }
   0x5   :  { %v23_v11 = vld [vmem:[%s573_s1 + $0x8] sm:$0xff]  ;;  %v24_v13 = vld [vmem:[%s575_s3] sm:$0xf]  ;;  %v467_v15 = vmov 12   ;;  %v468_v16 = vmov 15   ;;  %v469_v17 = vmov 8  }
   0x6   :  { %392 = vset.pattern.permute.xlu1 %v460_v4  ;;  %45 = vperm.xlu0 %390, %v25_v3   ;;  %v470_v18 = vmov 10   ;;  %v471_v19 = vmov 11   ;;  %v472_v20 = vmov 13   ;;  %v473_v21 = vmov 14   ;;  %v21_v25 = vld [vmem:[%s572_s0] sm:$0xff]  ;;  %s474_s0 = smov [#allocation2]  }
   0x7   :  { %72 = vperm.xlu1 %392, %v22_v0   ;;  %v38_v23 = vshrl.u32 %v37_v22, 7  ;;  %vm338_vm0 = vcmask 1043456   ;;  %s365_s4 = sshll.u32 %s474_s0, 4  ;;  %s366_s4 = int_to_ptr.vmem [resolvable:$true] %s365_s4 }
   0x8   :  { %s436_s29 = scalar_lea.vmem %s366_s4, 64  ;;  %p441_p1 = scmp.lt.s32.totalorder %s366_s4, %s366_s4 }
   0x9   :  { %v526_v24 = vsub.s32 0, %v38_v23  ;;  %v531_v26 = vsub.s32 1, %v38_v23  ;;  %v534_v28 = vsub.s32 2, %v38_v23  ;;  %v538_v34 = vsub.s32 3, %v38_v23  ;;  %p437_p0 = scmp.ne.s32.totalorder %s366_s4, %s436_s29  ;;  %p442_p2 = scmp.lt.s32.totalorder %s436_s29, %s436_s29 }
   0xa   :  { %393 = vset.pattern.permute.xlu0 %v461_v5  ;;  %v540_v36 = vsub.s32 4, %v38_v23  ;;  %v544_v44 = vsub.s32 5, %v38_v23  ;;  %v546_v45 = vsub.s32 6, %v38_v23  ;;  %v550_v54 = vsub.s32 7, %v38_v23 }
   0xb   :  { %394 = vset.pattern.permute.xlu1 %v462_v6  ;;  %88 = vperm.xlu0 %393, %v22_v0   ;;  %v40_v27 = vrot.slane %v21_v25, %v526_v24  ;;  %v66_v31 = vrot.slane %v21_v25, %v531_v26  ;;  %v82_v33 = vrot.slane %v21_v25, %v534_v28  ;;  %p443_p3 = por %p442_p2, %p441_p1 }
   0xc   :  { %104 = vperm.xlu1 %394, %v22_v0   ;;  %v98_v41 = vrot.slane %v21_v25, %v538_v34  ;;  %v114_v43 = vrot.slane %v21_v25, %v540_v36  ;;  %v130_v52 = vrot.slane %v21_v25, %v544_v44  ;;  %v146_v53 = vrot.slane %v21_v25, %v546_v45 }
   0xd   :  { %v162_v60 = vrot.slane %v21_v25, %v550_v54  ;;  %p444_p4 = pnand %p443_p3, %p437_p0 }
   0xf   :  { %396 = vset.pattern.permute.xlu0 %v463_v7 }
  0x10   :  { %395 = vset.pattern.permute.xlu1 %v464_v8  ;;  %136 = vperm.xlu0 %396, %v22_v0  }
  0x11   :  { %120 = vperm.xlu1 %395, %v22_v0  }
  0x14   :  { %399 = vset.pattern.permute.xlu0 %v459_v2 }
  0x15   :  { %397 = vset.pattern.permute.xlu1 %v465_v10  ;;  %50 = vperm.xlu0 %399, %v26_v9  }
  0x16   :  { %152 = vperm.xlu1 %397, %v22_v0  }
  0x19   :  { %402 = vset.pattern.permute.xlu0 %v461_v5 }
  0x1a   :  { %398 = vset.pattern.permute.xlu1 %v459_v2  ;;  %92 = vperm.xlu0 %402, %v23_v11  }
  0x1b   :  { %34 = vperm.xlu1 %398, %v23_v11  }
  0x1e   :  { %405 = vset.pattern.permute.xlu0 %v463_v7 }
  0x1f   :  { %400 = vset.pattern.permute.xlu1 %v458_v1  ;;  %140 = vperm.xlu0 %405, %v23_v11  }
  0x20   :  { %60 = vperm.xlu1 %400, %v23_v11  }
  0x23   :  { %408 = vset.pattern.permute.xlu0 %v459_v2 }
  0x24   :  { %401 = vset.pattern.permute.xlu1 %v460_v4  ;;  %184 = vperm.xlu0 %408, %v171_v12  }
  0x25   :  { %76 = vperm.xlu1 %401, %v23_v11  }
  0x28   :  { %411 = vset.pattern.permute.xlu0 %v461_v5 }
  0x29   :  { %403 = vset.pattern.permute.xlu1 %v462_v6  ;;  %209 = vperm.xlu0 %411, %v24_v13  }
  0x2a   :  { %108 = vperm.xlu1 %403, %v23_v11  }
  0x2d   :  { %414 = vset.pattern.permute.xlu0 %v463_v7 }
  0x2e   :  { %404 = vset.pattern.permute.xlu1 %v464_v8  ;;  %239 = vperm.xlu0 %414, %v24_v13  }
  0x2f   :  { %124 = vperm.xlu1 %404, %v23_v11  }
  0x32   :  { %417 = vset.pattern.permute.xlu0 %v466_v14 }
  0x33   :  { %406 = vset.pattern.permute.xlu1 %v465_v10  ;;  %269 = vperm.xlu0 %417, %v24_v13  }
  0x34   :  { %156 = vperm.xlu1 %406, %v23_v11  }
  0x37   :  { %420 = vset.pattern.permute.xlu0 %v467_v15 }
  0x38   :  { %407 = vset.pattern.permute.xlu1 %v459_v2  ;;  %299 = vperm.xlu0 %420, %v24_v13  }
  0x39   :  { %174 = vperm.xlu1 %407, %v24_v13  }
  0x3c   :  { %423 = vset.pattern.permute.xlu0 %v468_v16 }
  0x3d   :  { %409 = vset.pattern.permute.xlu1 %v458_v1  ;;  %329 = vperm.xlu0 %423, %v24_v13  }
  0x3e   :  { %189 = vperm.xlu1 %409, %v24_v13  }
  0x42   :  { %410 = vset.pattern.permute.xlu1 %v460_v4 }
  0x43   :  { %199 = vperm.xlu1 %410, %v24_v13  }
  0x47   :  { %412 = vset.pattern.permute.xlu1 %v462_v6 }
  0x48   :  { %219 = vperm.xlu1 %412, %v24_v13  }
  0x4c   :  { %413 = vset.pattern.permute.xlu1 %v464_v8 }
  0x4d   :  { %229 = vperm.xlu1 %413, %v24_v13  }
  0x51   :  { %415 = vset.pattern.permute.xlu1 %v465_v10 }
  0x52   :  { %249 = vperm.xlu1 %415, %v24_v13  }
  0x56   :  { %416 = vset.pattern.permute.xlu1 %v469_v17 }
  0x57   :  { %259 = vperm.xlu1 %416, %v24_v13  }
  0x5b   :  { %418 = vset.pattern.permute.xlu1 %v470_v18 }
  0x5c   :  { %279 = vperm.xlu1 %418, %v24_v13  }
  0x60   :  { %419 = vset.pattern.permute.xlu1 %v471_v19 }
  0x61   :  { %289 = vperm.xlu1 %419, %v24_v13  }
  0x65   :  { %421 = vset.pattern.permute.xlu1 %v472_v20 }
  0x66   :  { %309 = vperm.xlu1 %421, %v24_v13  }
  0x6a   :  { %422 = vset.pattern.permute.xlu1 %v473_v21 }
  0x6b   :  { %319 = vperm.xlu1 %422, %v24_v13  }
  0x7d   :  { %v57_v29 = vpop.permute.xlu1 %56  ;;  %v30_v30 = vpop.permute.xlu0 %29 }
  0x7e   :  { %v41_v32 = vmul.f32 %v40_v27, %v30_v30  ;;  %v67_v37 = vmul.f32 %v66_v31, %v57_v29 }
  0x81   :  { %v46_v35 = vpop.permute.xlu0 %45 }
  0x82   :  { %v53_v38 = vadd.f32 %v46_v35, %v41_v32  ;;  %v73_v39 = vpop.permute.xlu1 %72 }
  0x83   :  { %v83_v40 = vmul.f32 %v82_v33, %v73_v39 }
  0x84   :  { %v69_v42 = vadd.f32 %v67_v37, %v53_v38 }
  0x86   :  { %v85_v46 = vadd.f32 %v83_v40, %v69_v42  ;;  %v89_v47 = vpop.permute.xlu0 %88 }
  0x87   :  { %v99_v48 = vmul.f32 %v98_v41, %v89_v47  ;;  %v105_v49 = vpop.permute.xlu1 %104 }
  0x88   :  { %v115_v51 = vmul.f32 %v114_v43, %v105_v49 }
  0x89   :  { %v101_v50 = vadd.f32 %v99_v48, %v85_v46 }
  0x8b   :  { %v137_v55 = vpop.permute.xlu0 %136  ;;  %v117_v57 = vadd.f32 %v115_v51, %v101_v50 }
  0x8c   :  { %v121_v56 = vpop.permute.xlu1 %120  ;;  %v147_v59 = vmul.f32 %v146_v53, %v137_v55 }
  0x8d   :  { %v131_v58 = vmul.f32 %v130_v52, %v121_v56 }
  0x8f   :  { %v133_v61 = vadd.f32 %v131_v58, %v117_v57 }
  0x90   :  { %v51_v5 = vpop.permute.xlu0 %50 }
  0x91   :  { %v149_v62 = vadd.f32 %v147_v59, %v133_v61  ;;  %v153_v63 = vpop.permute.xlu1 %152 }
  0x92   :  { %v163_v0 = vmul.f32 %v162_v60, %v153_v63 }
  0x94   :  { %v165_v1 = vadd.f32 %v163_v0, %v149_v62 }
  0x95   :  { %v93_v9 = vpop.permute.xlu0 %92 }
  0x96   :  { %424 = vtanh.f32 %v165_v1  ;;  %v35_v2 = vpop.permute.xlu1 %34  ;;  %v100_v14 = vmul.f32 %v98_v41, %v93_v9 }
  0x97   :  { %v42_v3 = vmul.f32 %v40_v27, %v35_v2 }
  0x99   :  { %v54_v7 = vadd.f32 %v51_v5, %v42_v3 }
  0x9a   :  { %v141_v18 = vpop.permute.xlu0 %140 }
  0x9b   :  { %v61_v4 = vpop.permute.xlu1 %60  ;;  %v148_v21 = vmul.f32 %v146_v53, %v141_v18 }
  0x9c   :  { %v68_v6 = vmul.f32 %v66_v31, %v61_v4 }
  0x9e   :  { %v70_v10 = vadd.f32 %v68_v6, %v54_v7 }
  0x9f   :  { %v185_v40 = vpop.permute.xlu0 %184 }
  0xa0   :  { %v77_v8 = vpop.permute.xlu1 %76 }
  0xa1   :  { %v84_v11 = vmul.f32 %v82_v33, %v77_v8 }
  0xa3   :  { %v425_v12 = vpop.eup %424  ;;  %v86_v13 = vadd.f32 %v84_v11, %v70_v10 }
  0xa4   :  { %426 = vtanh.f32 %v425_v12  ;;  %v210_v51 = vpop.permute.xlu0 %209 }
  0xa5   :  { %v109_v15 = vpop.permute.xlu1 %108  ;;  %v102_v16 = vadd.f32 %v100_v14, %v86_v13 }
  0xa6   :  { %v116_v17 = vmul.f32 %v114_v43, %v109_v15 }
  0xa8   :  { %v118_v20 = vadd.f32 %v116_v17, %v102_v16 }
  0xa9   :  { %v240_v63 = vpop.permute.xlu0 %239 }
  0xaa   :  { %v125_v19 = vpop.permute.xlu1 %124 }
  0xab   :  { %v132_v22 = vmul.f32 %v130_v52, %v125_v19 }
  0xad   :  { %v134_v23 = vadd.f32 %v132_v22, %v118_v20 }
  0xae   :  { %v270_v12 = vpop.permute.xlu0 %269 }
  0xaf   :  { %v157_v25 = vpop.permute.xlu1 %156  ;;  %v150_v27 = vadd.f32 %v148_v21, %v134_v23 }
  0xb0   :  { %v164_v29 = vmul.f32 %v162_v60, %v157_v25 }
  0xb1   :  { %v427_v30 = vpop.eup %426 }
  0xb2   :  { %v166_v31 = vadd.f32 %v164_v29, %v150_v27  ;;  %v180_v33 = vrot.slane %v427_v30, %v526_v24  ;;  %v195_v38 = vrot.slane %v427_v30, %v531_v26  ;;  %v205_v42 = vrot.slane %v427_v30, %v534_v28 }
  0xb3   :  { %v215_v46 = vrot.slane %v427_v30, %v538_v34  ;;  %v225_v55 = vrot.slane %v427_v30, %v540_v36  ;;  %v235_v58 = vrot.slane %v427_v30, %v544_v44  ;;  %v245_v60 = vrot.slane %v427_v30, %v546_v45  ;;  %v300_v23 = vpop.permute.xlu0 %299 }
  0xb4   :  { %428 = vtanh.f32 %v166_v31  ;;  %v175_v32 = vpop.permute.xlu1 %174  ;;  %v255_v3 = vrot.slane %v427_v30, %v550_v54 }
  0xb5   :  { %v181_v35 = vmul.f32 %v180_v33, %v175_v32  ;;  %v216_v52 = vmul.f32 %v215_v46, %v210_v51  ;;  %v246_v1 = vmul.f32 %v245_v60, %v240_v63 }
  0xb7   :  { %v187_v41 = vadd.f32 %v185_v40, %v181_v35 }
  0xb8   :  { %v330_v35 = vpop.permute.xlu0 %329 }
  0xb9   :  { %v190_v37 = vpop.permute.xlu1 %189 }
  0xba   :  { %v196_v39 = vmul.f32 %v195_v38, %v190_v37 }
  0xbc   :  { %v197_v47 = vadd.f32 %v196_v39, %v187_v41 }
  0xbe   :  { %v200_v43 = vpop.permute.xlu1 %199 }
  0xbf   :  { %v206_v48 = vmul.f32 %v205_v42, %v200_v43 }
  0xc1   :  { %v429_v49 = vpop.eup %428  ;;  %v207_v50 = vadd.f32 %v206_v48, %v197_v47 }
  0xc2   :  { %430 = vtanh.f32 %v429_v49 }
  0xc3   :  { %v220_v53 = vpop.permute.xlu1 %219  ;;  %v217_v56 = vadd.f32 %v216_v52, %v207_v50 }
  0xc4   :  { %v226_v57 = vmul.f32 %v225_v55, %v220_v53 }
  0xc6   :  { %v227_v61 = vadd.f32 %v226_v57, %v217_v56 }
  0xc8   :  { %v230_v59 = vpop.permute.xlu1 %229 }
  0xc9   :  { %v236_v62 = vmul.f32 %v235_v58, %v230_v59 }
  0xcb   :  { %v237_v0 = vadd.f32 %v236_v62, %v227_v61 }
  0xcd   :  { %v250_v2 = vpop.permute.xlu1 %249  ;;  %v247_v5 = vadd.f32 %v246_v1, %v237_v0 }
  0xce   :  { %v256_v6 = vmul.f32 %v255_v3, %v250_v2 }
  0xcf   :  { %v431_v4 = vpop.eup %430 }
  0xd0   :  { %v275_v7 = vrot.slane %v431_v4, %v531_v26  ;;  %v265_v8 = vrot.slane %v431_v4, %v526_v24  ;;  %v257_v10 = vadd.f32 %v256_v6, %v247_v5  ;;  %v285_v15 = vrot.slane %v431_v4, %v534_v28 }
  0xd1   :  { %v305_v20 = vrot.slane %v431_v4, %v540_v36  ;;  %v295_v21 = vrot.slane %v431_v4, %v538_v34  ;;  %v315_v27 = vrot.slane %v431_v4, %v544_v44  ;;  %v335_v28 = vrot.slane %v431_v4, %v550_v54 }
  0xd2   :  { %v260_v9 = vpop.permute.xlu1 %259  ;;  %v276_v13 = vmul.f32 %v275_v7, %v270_v12  ;;  %v325_v33 = vrot.slane %v431_v4, %v546_v45 }
  0xd3   :  { %v266_v11 = vmul.f32 %v265_v8, %v260_v9  ;;  %v306_v24 = vmul.f32 %v305_v20, %v300_v23  ;;  %v336_v38 = vmul.f32 %v335_v28, %v330_v35 }
  0xd5   :  { %v267_v14 = vadd.f32 %v266_v11, %v257_v10 }
  0xd7   :  { %v280_v16 = vpop.permute.xlu1 %279  ;;  %v277_v17 = vadd.f32 %v276_v13, %v267_v14 }
  0xd8   :  { %v286_v18 = vmul.f32 %v285_v15, %v280_v16 }
  0xda   :  { %v287_v19 = vadd.f32 %v286_v18, %v277_v17 }
  0xdc   :  { %v290_v22 = vpop.permute.xlu1 %289 }
  0xdd   :  { %v296_v26 = vmul.f32 %v295_v21, %v290_v22 }
  0xdf   :  { %v297_v25 = vadd.f32 %v296_v26, %v287_v19 }
  0xe1   :  { %v310_v29 = vpop.permute.xlu1 %309  ;;  %v307_v30 = vadd.f32 %v306_v24, %v297_v25 }
  0xe2   :  { %v316_v31 = vmul.f32 %v315_v27, %v310_v29 }
  0xe4   :  { %v317_v32 = vadd.f32 %v316_v31, %v307_v30 }
  0xe6   :  { %v320_v37 = vpop.permute.xlu1 %319 }
  0xe7   :  { %v326_v36 = vmul.f32 %v325_v33, %v320_v37 }
  0xe9   :  { %v327_v34 = vadd.f32 %v326_v36, %v317_v32 }
  0xeb   :  { %v337_v39 = vadd.f32 %v336_v38, %v327_v34 }
  0xed   :  { %v339_v40 = vsel %vm338_vm0, %v337_v39, -inf }
  0xee   :  { %v340_v41 = vrot.slane %v339_v40, 4 }
  0xf0   :  { %v341_v42 = vmax.f32 %v339_v40, %v340_v41 }
  0xf2   :  { %v342_v43 = vrot.slane %v341_v42, 2 }
  0xf4   :  { %v343_v44 = vmax.f32 %v341_v42, %v342_v43 }
  0xf6   :  { %v344_v46 = vrot.slane %v343_v44, 1 }
  0xf8   :  { %v345_v47 = vmax.f32 %v343_v44, %v344_v46 }
  0xfa   :  { %v346_v48 = vsub.f32 %v337_v39, %v345_v47 }
  0xfc   :  { %v347_v49 = vmul.f32 1.442695, %v346_v48 }
  0xfe   :  { %432 = vpow2.f32 %v347_v49 }
 0x10b   :  { %v433_v54 = vpop.eup %432 }
 0x10c   :  { %v349_v50 = vsel %vm338_vm0, %v433_v54, 0.0 }
 0x10d   :  { %v350_v45 = vrot.slane %v349_v50, 4 }
 0x10f   :  { %v351_v51 = vadd.f32 %v350_v45, %v349_v50 }
 0x111   :  { %v352_v52 = vrot.slane %v351_v51, 2 }
 0x113   :  { %v353_v53 = vadd.f32 %v352_v52, %v351_v51 }
 0x115   :  { %v354_v55 = vrot.slane %v353_v53, 1 }
 0x117   :  { %v355_v56 = vadd.f32 %v354_v55, %v353_v53 }
 0x119   :  { %434 = vrcp.f32 %v355_v56 }
 0x126   :  { %v435_v57 = vpop.eup %434 }
 0x127   :  { %v357_v58 = vmul.f32 %v435_v57, %v433_v54 }
 0x129   :  { %358 = vst [vmem:[#allocation2] sm:$0xf] %v357_v58 }
 0x12a   :  { %447 = shalt.err (!%p444_p4)
}
 0x12b   :  { %368 = dma.vmem_to_hbm [thread:$0]  %s366_s4, 64, %s577_s5, [#allocation3]  }
 0x12c   :  { %456 = dma.done.wait [#allocation3], 64  }
 0x12d   :  { %457 = vsyncadd [#allocation3], 4294967232 }
 0x12e   :  { %372 = vsyncpa [#allocation3], 1 }

</bundles_post_ra>
